<compile_context>
chip_gen: v5e
topology: v5e:2x2
jax: 0.10.0
libtpu: 0.0.40
codegen_flags: <defaults>
</compile_context>

<pallas_src>
import numpy as np
import jax
import jax.numpy as jnp
from jax.experimental import pallas as pl
from jax.experimental.pallas import tpu as pltpu


def down_kernel(x00_ref, x01_ref, x10_ref, x11_ref, wc_ref, o_ref):
    """One (batch, output-row-block) tile of Down.forward.

    x??_ref : (1, C, L)  four 2x2-phase sub-grids of the edge-padded input,
                         spatially flattened; L = THo * Wo (lane-dense).
    wc_ref  : (Co, C)    1x1 conv weight (grid-invariant, a few KiB).
    o_ref   : (1, Co, L) output block.
    """
    # AvgPool2d(2, ceil_mode=True, count_include_pad=False): 2x2 window sum + /4 (VPU).
    # Edge-replicated padding (wrapper) makes the uniform /4 reproduce the
    # valid-element mean of ceil-mode partial windows exactly.
    pooled = (x00_ref[0] + x01_ref[0] + x10_ref[0] + x11_ref[0]) * 0.25      # (C, L)

    # 1x1 conv = channel mixing: one lane-dense MXU matmul, f32 accumulation.
    # (For very small C one could fold the four phases into the contraction, K=4C,
    #  to fill the MXU better; kept in the clearer pooled form here.)
    out = jnp.dot(wc_ref[...], pooled, preferred_element_type=jnp.float32)   # (Co, L)
    o_ref[0] = out.astype(o_ref.dtype)


def _pick_row_tile(Ho, Wo, C, Co, itemsize):
    """Pick the output-row tile THo.

    Constraints: THo divides Ho, and THo*Wo is a multiple of 128 (unmasked lane-dense
    stores) unless the whole image is a single block.  Preferences: double-buffered
    streamed bytes per grid step fit a conservative budget (well under the default
    scoped-VMEM limit of every generation, incl. v7x's 64 MiB physical VMEM), and
    >= 2 row blocks so the 'parallel' axis can feed both v7x TensorCores and overlap
    DMA with compute.
    """
    budget = 8 * 1024 * 1024  # bytes of double-buffered streamed blocks per grid step

    def step_bytes(t):
        return 2 * (4 * C + Co) * t * Wo * itemsize

    cands = [t for t in range(1, Ho + 1)
             if Ho % t == 0 and ((t * Wo) % 128 == 0 or t == Ho)]
    good = [t for t in cands if step_bytes(t) <= budget and Ho // t >= 2]
    if good:
        return max(good)
    fits = [t for t in cands if step_bytes(t) <= budget]
    if fits:
        return max(fits)
    return min(cands)


def down_forward(x, conv_w, *, row_tile=None, cast_to_bf16=False):
    """Down.forward(x).

    x      : (N, C, H, W)
    conv_w : (Co, C)  == Conv2d(C, Co, 1, bias=False).weight[:, :, 0, 0]
    cast_to_bf16: stream activations/weight as bf16 (halves HBM traffic on v6e/v7x,
                  MXU still accumulates f32).  Default off so the f32 reference check
                  holds at 1e-4 tolerance.
    """
    N, C, H, W = x.shape
    Co, Cin = conv_w.shape
    assert Cin == C
    Ho, Wo = -(-H // 2), -(-W // 2)            # ceil_mode=True output sizes
    He, We = 2 * Ho, 2 * Wo
    SO = Ho * Wo

    # ---- Layout plumbing (XLA side, cheap / fused) ----------------------------------
    # 1) Edge-replication pad to even spatial sizes: with padding=0 and
    #    count_include_pad=False, a partial ceil-mode window averages only its valid
    #    elements; replicating the last row/col makes the plain /4 average equal that.
    x_pad = jnp.pad(x, ((0, 0), (0, 0), (0, He - H), (0, We - W)), mode="edge")
    wc = conv_w
    if cast_to_bf16:
        x_pad = x_pad.astype(jnp.bfloat16)
        wc = wc.astype(jnp.bfloat16)
    # 2) De-interleave the four 2x2 phases and flatten spatial -> lane-dense last dim.
    #    Replaces the dense kron pooling matrix: no O(HW*SO) operand, no wasted MXU
    #    FLOPs; the kernel reads exactly one copy of the image.
    quads = [x_pad[:, :, dh::2, dw::2].reshape(N, C, SO)
             for dh in (0, 1) for dw in (0, 1)]

    itemsize = jnp.dtype(x_pad.dtype).itemsize
    tho = _pick_row_tile(Ho, Wo, C, Co, itemsize) if row_tile is None else row_tile
    assert Ho % tho == 0 and ((tho * Wo) % 128 == 0 or tho == Ho)
    L = tho * Wo
    grid = (N, Ho // tho)

    # TODO(synk): for tiny/odd images where Ho*Wo < 128 (e.g. 9x9 -> 25 lanes) the
    # output stores are masked; repacking C (or batch) into the lane dim would fix it.

    quad_spec = pl.BlockSpec((1, C, L), lambda n, r: (n, 0, r))
    out_flat = pl.pallas_call(
        down_kernel,
        out_shape=jax.ShapeDtypeStruct((N, Co, SO), x.dtype),
        grid=grid,
        in_specs=[quad_spec, quad_spec, quad_spec, quad_spec,
                  pl.BlockSpec((Co, C), lambda n, r: (0, 0))],
        out_specs=pl.BlockSpec((1, Co, L), lambda n, r: (n, 0, r)),
        # No vmem_limit override: tiles are sized by _pick_row_tile to stay well under
        # the default scoped-VMEM budget on v5e/v6e (128 MiB) and v7x (64 MiB physical).
        compiler_params=pltpu.CompilerParams(
            dimension_semantics=("parallel", "parallel")),
    )(*quads, wc)
    return out_flat.reshape(N, Co, Ho, Wo)


def _ref_down(x, conv_w):
    """Matrix-free reference: AvgPool2d(2, ceil_mode=True, count_include_pad=False)
    followed by a 1x1 conv (bias=False)."""
    xn = np.asarray(x, np.float32)
    N, C, H, W = xn.shape
    Ho, Wo = -(-H // 2), -(-W // 2)
    pooled = np.zeros((N, C, Ho, Wo), np.float32)
    for oh in range(Ho):
        h0, h1 = 2 * oh, min(2 * oh + 2, H)
        for ow in range(Wo):
            w0, w1 = 2 * ow, min(2 * ow + 2, W)
            pooled[:, :, oh, ow] = xn[:, :, h0:h1, w0:w1].mean(axis=(2, 3))
    return np.einsum("oc,nchw->nohw", np.asarray(conv_w, np.float32), pooled)


if __name__ == "__main__":
    key = jax.random.PRNGKey(0)
    k1, k2, k3 = jax.random.split(key, 3)

    # N=2, C=8, chan_factor=2 -> Co=16; H=W=32 gives Ho=Wo=16, row tile 8 -> lane
    # width 128 (lane-dense, unmasked stores) and 2 spatial blocks per image.
    N, C, H, W = 2, 8, 32, 32
    chan_factor = 2
    Co = int(C * chan_factor)
    x = jax.random.normal(k1, (N, C, H, W), jnp.float32)
    conv_w = (jax.random.normal(k2, (Co, C), jnp.float32) * 0.1).astype(jnp.float32)

    down_jit = jax.jit(down_forward)
    out = jax.block_until_ready(down_jit(x, conv_w))
    ref = _ref_down(x, conv_w)
    assert out.shape == (N, Co, H // 2, W // 2)
    assert np.allclose(np.asarray(out), ref, rtol=1e-4, atol=1e-4)

    # Odd spatial size exercises the ceil_mode / partial-window (edge-replication) path.
    x_odd = jax.random.normal(k3, (1, C, 9, 9), jnp.float32)
    out_odd = jax.block_until_ready(down_jit(x_odd, conv_w))
    ref_odd = _ref_down(x_odd, conv_w)
    assert out_odd.shape == (1, Co, 5, 5)
    assert np.allclose(np.asarray(out_odd), ref_odd, rtol=1e-4, atol=1e-4)

    print("KERNEL_OK")
</pallas_src>

<mosaic_0001>
module attributes {stable_mosaic.version = 11 : i64} {
  func.func @down_kernel(%arg0: i32, %arg1: i32, %arg2: memref<1x8x128xf32, #tpu.memory_space<vmem>>, %arg3: memref<1x8x128xf32, #tpu.memory_space<vmem>>, %arg4: memref<1x8x128xf32, #tpu.memory_space<vmem>>, %arg5: memref<1x8x128xf32, #tpu.memory_space<vmem>>, %arg6: memref<16x8xf32, #tpu.memory_space<vmem>>, %arg7: memref<1x16x128xf32, #tpu.memory_space<vmem>>) attributes {dimension_semantics = [#tpu.dimension_semantics<parallel>, #tpu.dimension_semantics<parallel>], iteration_bounds = array<i64: 2, 2>, scalar_prefetch = 0 : i64, scratch_operands = 0 : i64, tpu.core_type = #tpu.core_type<tc>, window_params = [{transform_indices = @transform_0, window_bounds = array<i64: 1, 8, 128>}, {transform_indices = @transform_1, window_bounds = array<i64: 1, 8, 128>}, {transform_indices = @transform_2, window_bounds = array<i64: 1, 8, 128>}, {transform_indices = @transform_3, window_bounds = array<i64: 1, 8, 128>}, {pipeline_mode = #tpu.pipeline_mode<synchronous>, transform_indices = @transform_4, window_bounds = array<i64: 16, 8>}, {transform_indices = @transform_5, window_bounds = array<i64: 1, 16, 128>}]} {
    %c0 = arith.constant 0 : index
    %c0_0 = arith.constant 0 : index
    %c0_1 = arith.constant 0 : index
    %0 = vector.load %arg2[%c0, %c0_0, %c0_1] : memref<1x8x128xf32, #tpu.memory_space<vmem>>, vector<1x8x128xf32>
    %1 = vector.shape_cast %0 : vector<1x8x128xf32> to vector<8x128xf32>
    %c0_2 = arith.constant 0 : index
    %c0_3 = arith.constant 0 : index
    %c0_4 = arith.constant 0 : index
    %2 = vector.load %arg3[%c0_2, %c0_3, %c0_4] : memref<1x8x128xf32, #tpu.memory_space<vmem>>, vector<1x8x128xf32>
    %3 = vector.shape_cast %2 : vector<1x8x128xf32> to vector<8x128xf32>
    %4 = arith.addf %1, %3 : vector<8x128xf32>
    %c0_5 = arith.constant 0 : index
    %c0_6 = arith.constant 0 : index
    %c0_7 = arith.constant 0 : index
    %5 = vector.load %arg4[%c0_5, %c0_6, %c0_7] : memref<1x8x128xf32, #tpu.memory_space<vmem>>, vector<1x8x128xf32>
    %6 = vector.shape_cast %5 : vector<1x8x128xf32> to vector<8x128xf32>
    %7 = arith.addf %4, %6 : vector<8x128xf32>
    %c0_8 = arith.constant 0 : index
    %c0_9 = arith.constant 0 : index
    %c0_10 = arith.constant 0 : index
    %8 = vector.load %arg5[%c0_8, %c0_9, %c0_10] : memref<1x8x128xf32, #tpu.memory_space<vmem>>, vector<1x8x128xf32>
    %9 = vector.shape_cast %8 : vector<1x8x128xf32> to vector<8x128xf32>
    %10 = arith.addf %7, %9 : vector<8x128xf32>
    %cst = arith.constant 2.500000e-01 : f32
    %11 = vector.broadcast %cst : f32 to vector<8x128xf32>
    %12 = arith.mulf %10, %11 : vector<8x128xf32>
    %c0_11 = arith.constant 0 : index
    %c0_12 = arith.constant 0 : index
    %13 = vector.load %arg6[%c0_11, %c0_12] : memref<16x8xf32, #tpu.memory_space<vmem>>, vector<16x8xf32>
    %cst_13 = arith.constant dense<0.000000e+00> : vector<16x128xf32>
    %14 = tpu.matmul %13, %12, %cst_13 {dimension_numbers = #tpu.dot_dimension_numbers<[1], [0], [0], [1], [0, 0, 1, 1], [], []>} : vector<16x8xf32>, vector<8x128xf32>, vector<16x128xf32> -> vector<16x128xf32>
    %c0_14 = arith.constant 0 : index
    %c0_15 = arith.constant 0 : index
    %c0_16 = arith.constant 0 : index
    %15 = vector.load %arg7[%c0_14, %c0_15, %c0_16] : memref<1x16x128xf32, #tpu.memory_space<vmem>>, vector<1x16x128xf32>
    %16 = vector.shape_cast %15 : vector<1x16x128xf32> to vector<16x128xf32>
    %17 = vector.shape_cast %14 : vector<16x128xf32> to vector<1x16x128xf32>
    tpu.vector_store %arg7[%c0_14, %c0_15, %c0_16], %17 {strides = array<i32>} : memref<1x16x128xf32, #tpu.memory_space<vmem>>, vector<1x16x128xf32>,
    return
  }
  func.func @transform_0(%arg0: i32, %arg1: i32) -> (i32, i32, i32) {
    %c0_i32 = arith.constant 0 : i32
    %c0_i32_0 = arith.constant 0 : i32
    return %arg0, %c0_i32, %arg1 : i32, i32, i32
  }
  func.func @transform_1(%arg0: i32, %arg1: i32) -> (i32, i32, i32) {
    %c0_i32 = arith.constant 0 : i32
    %c0_i32_0 = arith.constant 0 : i32
    return %arg0, %c0_i32, %arg1 : i32, i32, i32
  }
  func.func @transform_2(%arg0: i32, %arg1: i32) -> (i32, i32, i32) {
    %c0_i32 = arith.constant 0 : i32
    %c0_i32_0 = arith.constant 0 : i32
    return %arg0, %c0_i32, %arg1 : i32, i32, i32
  }
  func.func @transform_3(%arg0: i32, %arg1: i32) -> (i32, i32, i32) {
    %c0_i32 = arith.constant 0 : i32
    %c0_i32_0 = arith.constant 0 : i32
    return %arg0, %c0_i32, %arg1 : i32, i32, i32
  }
  func.func @transform_4(%arg0: i32, %arg1: i32) -> (i32, i32) {
    %c0_i32 = arith.constant 0 : i32
    %c0_i32_0 = arith.constant 0 : i32
    %c0_i32_1 = arith.constant 0 : i32
    return %c0_i32, %c0_i32_0 : i32, i32
  }
  func.func @transform_5(%arg0: i32, %arg1: i32) -> (i32, i32, i32) {
    %c0_i32 = arith.constant 0 : i32
    %c0_i32_0 = arith.constant 0 : i32
    return %arg0, %c0_i32, %arg1 : i32, i32, i32
  }
}

</mosaic_0001>

<bundles_post_ra>
// kernel: down_forward.1
= control target key start
LH: loop header
LB: loop body
LE: loop exit
PB: predicated region body
PF: predicated region fallthrough
CT: control target
= control target key end

     0   :  { %s715_s18 = smov 0   ;;  %s717_s19 = smov 0   ;;  %s825_s0 = inlined_call_operand.vmem [shape: f32[2,8,256], index: 0, kind: input, shape index: {}]   ;;  %s826_s1 = inlined_call_operand.vmem [shape: f32[2,8,256], index: 1, kind: input, shape index: {}]   ;;  %s827_s2 = inlined_call_operand.vmem [shape: f32[2,8,256], index: 2, kind: input, shape index: {}]   ;;  %s828_s3 = inlined_call_operand.vmem [shape: f32[2,8,256], index: 3, kind: input, shape index: {}]   ;;  %s829_s4 = inlined_call_operand.vmem [shape: f32[16,8], index: 4, kind: input, shape index: {}]   ;;  %s830_s5 = inlined_call_operand.vmem [shape: f32[2,16,256], index: 5, kind: output, shape index: {}]  }
   0x1   :  { %s719_s20 = smov 0   ;;  %s721_s21 = smov 0  }
   0x2   :  { %s723_s22 = smov 0   ;;  %s725_s23 = smov 0  }
   0x3   :  { %s727_s24 = smov 0  }
   0x4 LB: > { %834 = sst [smem:[#allocation3_spill]] %s679_s23  ;;  %s24_s25 = sadd.s32 1, %s675_s22  ;;  %s683_s24 = sphi %s727_s24, %s15_s24   ;;  %s679_s23 = sphi %s725_s23, %s840_s23   ;;  %s675_s22 = sphi %s723_s22, %s844_s22   ;;  %s671_s21 = sphi %s721_s21, %s838_s21   ;;  %s667_s20 = sphi %s719_s20, %s843_s20   ;;  %s663_s19 = sphi %s717_s19, %s842_s19   ;;  %s659_s18 = sphi %s715_s18, %s841_s18  }
   0x5   : > { %p25_p0 = scmp.ge.s32.totalorder %s24_s25, 2  ;;  %s27_s26 = sadd.s32 1, %s679_s23 }
   0x6   : > { %s551_s27 = sadd.s32 4294967295, %s683_s24   ;;  %p179_p1 = scmp.ne.s32.totalorder %s663_s19, %s659_s18 }
   0x7   : > { %s846_s25 = smov (%p25_p0, %s24_s25), 0  ;;  %s848_s26 = smov (!%p25_p0, %s27_s26), %s679_s23 }
   0x8   : > { %835 = sst [smem:[#allocation4_spill]] %s846_s25  ;;  %s165_s28 = ssub.s32 %s675_s22, %s846_s25 }
   0x9   : > { %p180_p2 = scmp.eq.s32.totalorder %s551_s27, 3  ;;  %p29_p3 = scmp.ge.s32.totalorder %s848_s26, 2 }
   0xa   : > { %p555_p4 = scmp.ge.s32.totalorder %s683_s24, 1  ;;  %p251_p6 = scmp.lt.s32.totalorder %s683_s24, 5 }
   0xb   : > { %p761_p5 = por %p180_p2, %p179_p1  ;;  %s850_s26 = smov (%p29_p3, %s848_s26), 0 }
   0xc   : > { %837 = sst [smem:[#allocation5_spill]] %s850_s26  ;;  %p252_p7 = pnand %p555_p4, %p251_p6 }
   0xd   : > { %s164_s30 = ssub.s32 %s679_s23, %s850_s26  ;;  %s169_s7 = sadd.s32 1, %s663_s19 }
   0xe   : > { %s166_s6 = sor.u32 %s165_s28, %s164_s30  ;;  %255 = sbr.rel (%p252_p7) target bundleno = 172 (0xac), region = 40 }
   0xf   : > { %p167_p8 = scmp.eq.s32.totalorder %s166_s6, 0  ;;  %p305_p9 = scmp.lt.s32.totalorder (!%p252_p7), %s671_s21, 1 }
  0x10   : > { %p307_p10 = scmp.lt.s32.totalorder (!%p252_p7), %s667_s20, 1  ;;  %s302_s25 = sand.u32 (!%p252_p7), 1, %s659_s18  }
  0x11   : > { %s772_s8 = scalar_select %p167_p8, %s663_s19, %s169_s7  }
  0x12   : > { %s556_s26 = sshll.u32 (!%p252_p7), %s302_s25, 4 }
  0x13   : > { %s306_s9 = scalar_select %p305_p9, %s671_s21, 1  ;;  %v345_v8 = vld [vmem:[%s829_s4] sm:$0xff]  ;;  %vm347_vm0 = vcmask 64512   ;;  %v346_v9 = vld [vmem:[%s829_s4 + $0x8] sm:$0xff] }
  0x14   : > { %s308_s10 = scalar_select %p307_p10, %s667_s20, 1 }
  0x15   : > { %s557_s11 = sshll.u32 %s306_s9, 1 }
  0x16   : > { %s310_s12 = sadd.s32 %s557_s11, %s308_s10 }
  0x17   : > { %s558_s13 = sshll.u32 %s310_s12, 3 }
  0x18   : > { %s312_s16 = scalar_lea.vmem %s825_s0, %s558_s13  ;;  %s320_s28 = scalar_lea.vmem %s826_s1, %s558_s13 }
  0x19   : > { %s328_s7 = scalar_lea.vmem %s827_s2, %s558_s13  ;;  %s336_s23 = scalar_lea.vmem %s828_s3, %s558_s13  ;;  %v337_v0 = vld [vmem:[%s312_s16] sm:$0xff] }
  0x1a   : > { %v338_v1 = vld [vmem:[%s320_s28] sm:$0xff]  ;;  %s568_s13 = sshll.u32 (%p761_p5), %s671_s21, 2 }
  0x1b   : > { %v339_v2 = vadd.f32 %v338_v1, %v337_v0  ;;  %v340_v3 = vld [vmem:[%s328_s7] sm:$0xff]  ;;  %s387_s14 = sadd.s32 (%p761_p5), %s667_s20, %s568_s13 }
  0x1c   : > { %v342_v4 = vld [vmem:[%s336_s23] sm:$0xff]  ;;  %s304_s23 = scalar_lea.vmem [#allocation2], %s556_s26  ;;  %s569_s15 = sshll.u32 (%p761_p5), %s387_s14, 3 }
  0x1d   : > { %v341_v5 = vadd.f32 %v340_v3, %v339_v2  ;;  %s389_s18 = scalar_lea.vmem (%p761_p5), %s830_s5, %s569_s15 }
  0x1f   : > { %v343_v6 = vadd.f32 %v342_v4, %v341_v5 }
  0x21   : > { %v344_v7 = vmul.f32 0.25, %v343_v6 }
  0x23   : > { %369 = vmatpush.msra.mxu0 %v344_v7  ;;  %572 = vmatpush.msra.mxu1 %v344_v7 }
  0x24   : > { %565 = vmatmul.msk.f32.vlgmr.msra.gmra.mxu0 %vm347_vm0, %v345_v8  ;;  %566 = vmatmul.msk.f32.vlgmr.msra.gmra.mxu1 %vm347_vm0, %v346_v9 }
  0x9f   : > { %385 = sbr.rel (!%p761_p5) target bundleno = 172 (0xac), region = 44 }
  0xa1   : > { %v371_v10 = vpop.f32.mrf.mxu0  ;;  %v374_v11 = vpop.f32.mrf.mxu1 }
  0xa2   : > { %377 = vst [vmem:[%s304_s23] sm:$0xff] %v371_v10 }
  0xa3   : > { %378 = vst [vmem:[%s304_s23 + $0x8] sm:$0xff] %v374_v11 }
  0xa9   : > { %v420_v12 = vld [vmem:[%s304_s23] sm:$0xff] }
  0xaa   : > { %v422_v13 = vld [vmem:[%s304_s23 + $0x8] sm:$0xff]  ;;  %421 = vst [vmem:[%s389_s18] sm:$0xff] %v420_v12 }
  0xab   : > { %423 = vst [vmem:[%s389_s18 + $0x10] sm:$0xff] %v422_v13 }
  0xac PF: > { %s15_s24 = sadd.s32 1, %s683_s24   ;;  %s838_s21 = sld [smem:[#allocation3_spill]] }
  0xad   : > { %p12_p11 = scmp.ge.s32.totalorder %s15_s24, 6   ;;  %s839_s29 = sld [smem:[#allocation4_spill]] }
  0xae   : > { %s840_s23 = sld [smem:[#allocation5_spill]]  ;;  %s841_s18 = smov %s663_s19 }
  0xaf   : > { %s842_s19 = smov %s772_s8  ;;  %s843_s20 = smov %s675_s22 }
  0xb0   :  { %14 = sbr.rel (!%p12_p11) target bundleno = 4 (0x4), region = 117 }
  0xb3   : > { %s844_s22 = smov %s839_s29 }

</bundles_post_ra>
